<compile_context>
chip_gen: v7x
topology: tpu7x:2x2x1
jax: 0.10.0
libtpu: 0.0.40
codegen_flags: <defaults>
</compile_context>

<pallas_src>
import functools

import jax
import jax.numpy as jnp
from jax.experimental import pallas as pl
from jax.experimental.pallas import tpu as pltpu


def outcombine_kernel(x_ref, w1_ref, s_ref, b1_ref, w2_ref, b2_ref, o_ref, *, H, W):
    # x_ref : (1, Cin, H*W + 2*(W+1)) bf16  lane-halo-padded input, channels on sublanes
    # w1_ref: (Cmid, 9*Cin)           bf16  w1t[m, (ky*3+kx)*Cin + c] = w_conv1[ky, kx, c, m]
    # s_ref : (Cmid, 1)               f32   fused BN scale
    # b1_ref: (Cmid, 1)               f32   fused BN bias (includes conv1 bias)
    # w2_ref: (Cout, Cmid)            bf16  1x1 conv weight (transposed)
    # b2_ref: (Cout, 1)               f32   1x1 conv bias
    # o_ref : (1, Cout, H*W)          f32
    HW = H * W
    xp = x_ref[0]                      # (Cin, HW + 2W + 2)
    Cin = xp.shape[0]

    # Per-output-pixel column index j = p mod W; masks the row-wrap of the dx = 0 / 2 taps.
    col = jax.lax.broadcasted_iota(jnp.int32, (Cin, HW), 1) % W
    mask_left = col >= 1               # valid lanes for dx == 0 taps
    mask_right = col <= (W - 2)        # valid lanes for dx == 2 taps

    # Build the (9*Cin, HW) im2col matrix from 9 static lane-shifted windows.
    taps = []
    for k in range(9):
        dy, dx = k // 3, k % 3
        start = dy * W + dx            # == (W+1) + (dy-1)*W + (dx-1)
        win = jax.lax.slice(xp, (0, start), (Cin, start + HW))   # (Cin, HW)
        if dx == 0:
            win = jnp.where(mask_left, win, jnp.zeros_like(win))
        elif dx == 2:
            win = jnp.where(mask_right, win, jnp.zeros_like(win))
        taps.append(win)
    im2col = jnp.concatenate(taps, axis=0)                        # (9*Cin, HW) bf16

    # Conv3x3 as one K = 9*Cin contraction, f32 accumulation, lane-dense N = H*W output.
    acc = jnp.dot(w1_ref[...], im2col, preferred_element_type=jnp.float32)  # (Cmid, HW)

    # BatchNorm (inference, folded scale/bias) + ReLU in f32, broadcast along lanes.
    h = jnp.maximum(acc * s_ref[...] + b1_ref[...], 0.0)

    # Dropout2d(0.1) is identity in eval mode.

    # Conv1x1: (Cout, Cmid) @ (Cmid, HW) -> lane-dense (Cout, HW) output slab.
    out = jnp.dot(w2_ref[...], h.astype(w2_ref.dtype),
                  preferred_element_type=jnp.float32) + b2_ref[...]
    o_ref[...] = out.reshape(o_ref.shape).astype(o_ref.dtype)


def out_combine_forward(x_nchw, params):
    """x_nchw: (B, Cin, H, W) float32 -> (B, Cout, H, W) float32."""
    w1 = params["w1"]            # (3, 3, Cin, Cmid)  HWIO
    b_conv1 = params["b_conv1"]  # (Cmid,)
    gamma = params["gamma"]
    beta = params["beta"]
    run_mean = params["run_mean"]
    run_var = params["run_var"]
    w2 = params["w2"]            # (Cmid, Cout)
    b2 = params["b2"]            # (Cout,)
    eps = 1e-5

    B, Cin, H, W = x_nchw.shape
    Cmid = w1.shape[-1]
    Cout = w2.shape[-1]
    HW = H * W
    halo = W + 1

    # Kernel consumes NCHW directly as (B, Cin, H*W) with a (W+1)-lane halo; the reshape +
    # bf16 cast + pad fuse into one small XLA op (no NCHW->NHWC transpose, no 2-D spatial pad).
    x_flat = x_nchw.reshape(B, Cin, HW).astype(jnp.bfloat16)
    x_halo = jnp.pad(x_flat, ((0, 0), (0, 0), (halo, halo)))

    # Fold conv1 bias + BatchNorm (running stats) into per-channel scale/bias (kept in f32).
    scale = gamma / jnp.sqrt(run_var + eps)                 # (Cmid,)
    bias1 = scale * (b_conv1 - run_mean) + beta             # (Cmid,)

    # Single 2-D weight for the fused contraction: w1t[m, (ky*3+kx)*Cin + c] = w1[ky,kx,c,m].
    w1t = jnp.transpose(w1, (3, 0, 1, 2)).reshape(Cmid, 9 * Cin).astype(jnp.bfloat16)
    w2t = jnp.transpose(w2, (1, 0)).astype(jnp.bfloat16)    # (Cout, Cmid)
    s_col = scale.reshape(Cmid, 1)
    b1_col = bias1.reshape(Cmid, 1)
    b2_col = b2.reshape(Cout, 1)

    out_flat = pl.pallas_call(
        functools.partial(outcombine_kernel, H=H, W=W),
        out_shape=jax.ShapeDtypeStruct((B, Cout, HW), jnp.float32),
        grid_spec=pltpu.PrefetchScalarGridSpec(
            num_scalar_prefetch=0,
            grid=(B,),
            in_specs=[
                pl.BlockSpec((1, Cin, HW + 2 * halo), lambda b: (b, 0, 0)),
                pl.BlockSpec((Cmid, 9 * Cin), lambda b: (0, 0)),
                pl.BlockSpec((Cmid, 1), lambda b: (0, 0)),
                pl.BlockSpec((Cmid, 1), lambda b: (0, 0)),
                pl.BlockSpec((Cout, Cmid), lambda b: (0, 0)),
                pl.BlockSpec((Cout, 1), lambda b: (0, 0)),
            ],
            out_specs=pl.BlockSpec((1, Cout, HW), lambda b: (b, 0, 0)),
        ),
        compiler_params=pltpu.CompilerParams(
            dimension_semantics=("parallel",)),
    )(x_halo, w1t, s_col, b1_col, w2t, b2_col)

    # (B, Cout, H*W) is already NCHW-ordered; this reshape is free.
    return out_flat.reshape(B, Cout, H, W)


def reference_forward(x_nchw, params):
    """Pure-JAX f32 reference (mirrors the PyTorch module in eval mode)."""
    eps = 1e-5
    w1 = params["w1"]  # (3,3,Cin,Cmid) HWIO
    x = jnp.transpose(x_nchw, (0, 2, 3, 1))
    y = jax.lax.conv_general_dilated(
        x, w1, window_strides=(1, 1), padding=((1, 1), (1, 1)),
        dimension_numbers=("NHWC", "HWIO", "NHWC"))
    y = y + params["b_conv1"]
    scale = params["gamma"] / jnp.sqrt(params["run_var"] + eps)
    y = (y - params["run_mean"]) * scale + params["beta"]
    y = jnp.maximum(y, 0.0)
    y = jnp.einsum("bhwc,co->bhwo", y, params["w2"]) + params["b2"]
    return jnp.transpose(y, (0, 3, 1, 2))


def make_params(key, in_channels, out_channels):
    cmid = in_channels // 4
    keys = jax.random.split(key, 8)
    params = {
        "w1": jax.random.normal(keys[0], (3, 3, in_channels, cmid), jnp.float32) * 0.1,
        "b_conv1": jax.random.normal(keys[1], (cmid,), jnp.float32) * 0.1,
        "gamma": 1.0 + 0.1 * jax.random.normal(keys[2], (cmid,), jnp.float32),
        "beta": 0.1 * jax.random.normal(keys[3], (cmid,), jnp.float32),
        "run_mean": 0.1 * jax.random.normal(keys[4], (cmid,), jnp.float32),
        "run_var": 1.0 + 0.1 * jax.random.uniform(keys[5], (cmid,), jnp.float32),
        "w2": jax.random.normal(keys[6], (cmid, out_channels), jnp.float32) * 0.1,
        "b2": jax.random.normal(keys[7], (out_channels,), jnp.float32) * 0.1,
    }
    return params


if __name__ == "__main__":
    key = jax.random.PRNGKey(0)
    k_x, k_p = jax.random.split(key)

    B, Cin, H, W = 2, 16, 16, 16
    Cout = 8

    x = jax.random.normal(k_x, (B, Cin, H, W), jnp.float32)
    params = make_params(k_p, Cin, Cout)

    out = jax.block_until_ready(out_combine_forward(x, params))
    ref = jax.block_until_ready(reference_forward(x, params))

    assert out.shape == (B, Cout, H, W), out.shape
    # bf16 MXU operands (f32 accumulation) -> relaxed tolerance vs the pure-f32 reference.
    assert jnp.allclose(out, ref, atol=5e-2, rtol=5e-2), (
        "mismatch vs reference; max abs diff = %f" % float(jnp.max(jnp.abs(out - ref))))

    print("KERNEL_OK")
</pallas_src>

<mosaic_0001>
module attributes {stable_mosaic.version = 11 : i64} {
  func.func @outcombine_kernel(%arg0: i32, %arg1: memref<1x16x290xbf16, #tpu.memory_space<vmem>>, %arg2: memref<4x144xbf16, #tpu.memory_space<vmem>>, %arg3: memref<4x1xf32, #tpu.memory_space<vmem>>, %arg4: memref<4x1xf32, #tpu.memory_space<vmem>>, %arg5: memref<8x4xbf16, #tpu.memory_space<vmem>>, %arg6: memref<8x1xf32, #tpu.memory_space<vmem>>, %arg7: memref<1x8x256xf32, #tpu.memory_space<vmem>>) attributes {dimension_semantics = [#tpu.dimension_semantics<parallel>], iteration_bounds = array<i64: 2>, scalar_prefetch = 0 : i64, scratch_operands = 0 : i64, tpu.core_type = #tpu.core_type<tc>, window_params = [{transform_indices = @transform_0, window_bounds = array<i64: 1, 16, 290>}, {pipeline_mode = #tpu.pipeline_mode<synchronous>, transform_indices = @transform_1, window_bounds = array<i64: 4, 144>}, {pipeline_mode = #tpu.pipeline_mode<synchronous>, transform_indices = @transform_2, window_bounds = array<i64: 4, 1>}, {pipeline_mode = #tpu.pipeline_mode<synchronous>, transform_indices = @transform_3, window_bounds = array<i64: 4, 1>}, {pipeline_mode = #tpu.pipeline_mode<synchronous>, transform_indices = @transform_4, window_bounds = array<i64: 8, 4>}, {pipeline_mode = #tpu.pipeline_mode<synchronous>, transform_indices = @transform_5, window_bounds = array<i64: 8, 1>}, {transform_indices = @transform_6, window_bounds = array<i64: 1, 8, 256>}]} {
    %c0 = arith.constant 0 : index
    %c0_0 = arith.constant 0 : index
    %c0_1 = arith.constant 0 : index
    %0 = vector.load %arg1[%c0, %c0_0, %c0_1] : memref<1x16x290xbf16, #tpu.memory_space<vmem>>, vector<1x16x290xbf16>
    %1 = vector.shape_cast %0 : vector<1x16x290xbf16> to vector<16x290xbf16>
    %2 = tpu.iota {dimensions = array<i32: 1>} : vector<16x256xi32>
    %c16_i32 = arith.constant 16 : i32
    %c0_i32 = arith.constant 0 : i32
    %3 = arith.cmpi eq, %c16_i32, %c0_i32 : i32
    %c1_i32 = arith.constant 1 : i32
    %4 = arith.select %3, %c1_i32, %c16_i32 : i32
    %5 = vector.broadcast %4 : i32 to vector<16x256xi32>
    %6 = arith.remsi %2, %5 : vector<16x256xi32>
    %c0_i32_2 = arith.constant 0 : i32
    %7 = vector.broadcast %c0_i32_2 : i32 to vector<16x256xi32>
    %8 = arith.cmpi ne, %6, %7 : vector<16x256xi32>
    %c0_i32_3 = arith.constant 0 : i32
    %9 = vector.broadcast %c0_i32_3 : i32 to vector<16x256xi32>
    %10 = arith.cmpi slt, %6, %9 : vector<16x256xi32>
    %c0_i32_4 = arith.constant 0 : i32
    %11 = arith.cmpi slt, %4, %c0_i32_4 : i32
    %12 = vector.broadcast %11 : i1 to vector<16x256xi1>
    %13 = vector.broadcast %12 : vector<16x256xi1> to vector<16x256xi1>
    %14 = arith.xori %10, %13 : vector<16x256xi1>
    %15 = arith.andi %14, %8 : vector<16x256xi1>
    %16 = vector.broadcast %4 : i32 to vector<16x256xi32>
    %17 = arith.addi %6, %16 : vector<16x256xi32>
    %18 = arith.select %15, %17, %6 : vector<16x256xi1>, vector<16x256xi32>
    %c1_i32_5 = arith.constant 1 : i32
    %19 = vector.broadcast %c1_i32_5 : i32 to vector<16x256xi32>
    %20 = arith.cmpi sge, %18, %19 : vector<16x256xi32>
    %c14_i32 = arith.constant 14 : i32
    %21 = vector.broadcast %c14_i32 : i32 to vector<16x256xi32>
    %22 = arith.cmpi sle, %18, %21 : vector<16x256xi32>
    %23 = vector.extract_strided_slice %1 {offsets = [0, 0], sizes = [16, 256], strides = [1, 1]} : vector<16x290xbf16> to vector<16x256xbf16>
    %cst = arith.constant 0.000000e+00 : bf16
    %24 = vector.broadcast %cst : bf16 to vector<16x256xbf16>
    %25 = arith.select %20, %23, %24 : vector<16x256xi1>, vector<16x256xbf16>
    %26 = vector.extract_strided_slice %1 {offsets = [0, 1], sizes = [16, 256], strides = [1, 1]} : vector<16x290xbf16> to vector<16x256xbf16>
    %27 = vector.extract_strided_slice %1 {offsets = [0, 2], sizes = [16, 256], strides = [1, 1]} : vector<16x290xbf16> to vector<16x256xbf16>
    %cst_6 = arith.constant 0.000000e+00 : bf16
    %28 = vector.broadcast %cst_6 : bf16 to vector<16x256xbf16>
    %29 = arith.select %22, %27, %28 : vector<16x256xi1>, vector<16x256xbf16>
    %30 = vector.extract_strided_slice %1 {offsets = [0, 16], sizes = [16, 256], strides = [1, 1]} : vector<16x290xbf16> to vector<16x256xbf16>
    %cst_7 = arith.constant 0.000000e+00 : bf16
    %31 = vector.broadcast %cst_7 : bf16 to vector<16x256xbf16>
    %32 = arith.select %20, %30, %31 : vector<16x256xi1>, vector<16x256xbf16>
    %33 = vector.extract_strided_slice %1 {offsets = [0, 17], sizes = [16, 256], strides = [1, 1]} : vector<16x290xbf16> to vector<16x256xbf16>
    %34 = vector.extract_strided_slice %1 {offsets = [0, 18], sizes = [16, 256], strides = [1, 1]} : vector<16x290xbf16> to vector<16x256xbf16>
    %cst_8 = arith.constant 0.000000e+00 : bf16
    %35 = vector.broadcast %cst_8 : bf16 to vector<16x256xbf16>
    %36 = arith.select %22, %34, %35 : vector<16x256xi1>, vector<16x256xbf16>
    %37 = vector.extract_strided_slice %1 {offsets = [0, 32], sizes = [16, 256], strides = [1, 1]} : vector<16x290xbf16> to vector<16x256xbf16>
    %cst_9 = arith.constant 0.000000e+00 : bf16
    %38 = vector.broadcast %cst_9 : bf16 to vector<16x256xbf16>
    %39 = arith.select %20, %37, %38 : vector<16x256xi1>, vector<16x256xbf16>
    %40 = vector.extract_strided_slice %1 {offsets = [0, 33], sizes = [16, 256], strides = [1, 1]} : vector<16x290xbf16> to vector<16x256xbf16>
    %41 = vector.extract_strided_slice %1 {offsets = [0, 34], sizes = [16, 256], strides = [1, 1]} : vector<16x290xbf16> to vector<16x256xbf16>
    %cst_10 = arith.constant 0.000000e+00 : bf16
    %42 = vector.broadcast %cst_10 : bf16 to vector<16x256xbf16>
    %43 = arith.select %22, %41, %42 : vector<16x256xi1>, vector<16x256xbf16>
    %44 = tpu.concatenate %25, %26, %29, %32, %33, %36, %39, %40, %43 in 0 : vector<16x256xbf16>, vector<16x256xbf16>, vector<16x256xbf16>, vector<16x256xbf16>, vector<16x256xbf16>, vector<16x256xbf16>, vector<16x256xbf16>, vector<16x256xbf16>, vector<16x256xbf16> -> vector<144x256xbf16>
    %c0_11 = arith.constant 0 : index
    %c0_12 = arith.constant 0 : index
    %45 = vector.load %arg2[%c0_11, %c0_12] : memref<4x144xbf16, #tpu.memory_space<vmem>>, vector<4x144xbf16>
    %cst_13 = arith.constant dense<0.000000e+00> : vector<4x256xf32>
    %46 = tpu.matmul %45, %44, %cst_13 {dimension_numbers = #tpu.dot_dimension_numbers<[1], [0], [0], [1], [0, 0, 1, 1], [], []>} : vector<4x144xbf16>, vector<144x256xbf16>, vector<4x256xf32> -> vector<4x256xf32>
    %c0_14 = arith.constant 0 : index
    %c0_15 = arith.constant 0 : index
    %47 = vector.load %arg3[%c0_14, %c0_15] : memref<4x1xf32, #tpu.memory_space<vmem>>, vector<4x1xf32>
    %48 = vector.broadcast %47 : vector<4x1xf32> to vector<4x256xf32>
    %49 = arith.mulf %46, %48 : vector<4x256xf32>
    %c0_16 = arith.constant 0 : index
    %c0_17 = arith.constant 0 : index
    %50 = vector.load %arg4[%c0_16, %c0_17] : memref<4x1xf32, #tpu.memory_space<vmem>>, vector<4x1xf32>
    %51 = vector.broadcast %50 : vector<4x1xf32> to vector<4x256xf32>
    %52 = arith.addf %49, %51 : vector<4x256xf32>
    %cst_18 = arith.constant 0.000000e+00 : f32
    %53 = vector.broadcast %cst_18 : f32 to vector<4x256xf32>
    %54 = arith.maximumf %52, %53 : vector<4x256xf32>
    %c0_19 = arith.constant 0 : index
    %c0_20 = arith.constant 0 : index
    %55 = vector.load %arg5[%c0_19, %c0_20] : memref<8x4xbf16, #tpu.memory_space<vmem>>, vector<8x4xbf16>
    %56 = arith.truncf %54 : vector<4x256xf32> to vector<4x256xbf16>
    %cst_21 = arith.constant dense<0.000000e+00> : vector<8x256xf32>
    %57 = tpu.matmul %55, %56, %cst_21 {dimension_numbers = #tpu.dot_dimension_numbers<[1], [0], [0], [1], [0, 0, 1, 1], [], []>} : vector<8x4xbf16>, vector<4x256xbf16>, vector<8x256xf32> -> vector<8x256xf32>
    %c0_22 = arith.constant 0 : index
    %c0_23 = arith.constant 0 : index
    %58 = vector.load %arg6[%c0_22, %c0_23] : memref<8x1xf32, #tpu.memory_space<vmem>>, vector<8x1xf32>
    %59 = vector.broadcast %58 : vector<8x1xf32> to vector<8x256xf32>
    %60 = arith.addf %57, %59 : vector<8x256xf32>
    %61 = vector.shape_cast %60 : vector<8x256xf32> to vector<1x8x256xf32>
    %c0_24 = arith.constant 0 : index
    %c0_25 = arith.constant 0 : index
    %c0_26 = arith.constant 0 : index
    %62 = vector.load %arg7[%c0_24, %c0_25, %c0_26] : memref<1x8x256xf32, #tpu.memory_space<vmem>>, vector<1x8x256xf32>
    tpu.vector_store %arg7[%c0_24, %c0_25, %c0_26], %61 {strides = array<i32>} : memref<1x8x256xf32, #tpu.memory_space<vmem>>, vector<1x8x256xf32>,
    return
  }
  func.func @transform_0(%arg0: i32) -> (i32, i32, i32) {
    %c0_i32 = arith.constant 0 : i32
    %c0_i32_0 = arith.constant 0 : i32
    %c0_i32_1 = arith.constant 0 : i32
    return %arg0, %c0_i32, %c0_i32_0 : i32, i32, i32
  }
  func.func @transform_1(%arg0: i32) -> (i32, i32) {
    %c0_i32 = arith.constant 0 : i32
    %c0_i32_0 = arith.constant 0 : i32
    %c0_i32_1 = arith.constant 0 : i32
    return %c0_i32, %c0_i32_0 : i32, i32
  }
  func.func @transform_2(%arg0: i32) -> (i32, i32) {
    %c0_i32 = arith.constant 0 : i32
    %c0_i32_0 = arith.constant 0 : i32
    %c0_i32_1 = arith.constant 0 : i32
    return %c0_i32, %c0_i32_0 : i32, i32
  }
  func.func @transform_3(%arg0: i32) -> (i32, i32) {
    %c0_i32 = arith.constant 0 : i32
    %c0_i32_0 = arith.constant 0 : i32
    %c0_i32_1 = arith.constant 0 : i32
    return %c0_i32, %c0_i32_0 : i32, i32
  }
  func.func @transform_4(%arg0: i32) -> (i32, i32) {
    %c0_i32 = arith.constant 0 : i32
    %c0_i32_0 = arith.constant 0 : i32
    %c0_i32_1 = arith.constant 0 : i32
    return %c0_i32, %c0_i32_0 : i32, i32
  }
  func.func @transform_5(%arg0: i32) -> (i32, i32) {
    %c0_i32 = arith.constant 0 : i32
    %c0_i32_0 = arith.constant 0 : i32
    %c0_i32_1 = arith.constant 0 : i32
    return %c0_i32, %c0_i32_0 : i32, i32
  }
  func.func @transform_6(%arg0: i32) -> (i32, i32, i32) {
    %c0_i32 = arith.constant 0 : i32
    %c0_i32_0 = arith.constant 0 : i32
    %c0_i32_1 = arith.constant 0 : i32
    return %arg0, %c0_i32, %c0_i32_0 : i32, i32, i32
  }
}

</mosaic_0001>

<bundles_post_ra>
// kernel: tpu_custom_call.1
= control target key start
LH: loop header
LB: loop body
LE: loop exit
PB: predicated region body
PF: predicated region fallthrough
CT: control target
= control target key end

     0   :  { %11 = vsyncpa [#allocation3], 0  ;;  %s1292_s0 = inlined_call_operand.hbm [shape: bf16[2,16,290], index: 0, kind: input, shape index: {}]   ;;  %s1293_s1 = inlined_call_operand.vmem [shape: bf16[4,144], index: 1, kind: input, shape index: {}]   ;;  %s1294_s2 = inlined_call_operand.vmem [shape: f32[4,1], index: 2, kind: input, shape index: {}]   ;;  %s1295_s3 = inlined_call_operand.vmem [shape: f32[4,1], index: 3, kind: input, shape index: {}]   ;;  %s1296_s4 = inlined_call_operand.vmem [shape: bf16[8,4], index: 4, kind: input, shape index: {}]   ;;  %s1297_s5 = inlined_call_operand.vmem [shape: f32[8,1], index: 5, kind: input, shape index: {}]   ;;  %s1298_s6 = inlined_call_operand.hbm [shape: f32[2,8,256], index: 6, kind: output, shape index: {}]  }
   0x1   :  { %13 = vsyncpa [#allocation3 + $0x1], 0 }
   0x2   :  { %14 = vsyncpa [#allocation4], 0 }
   0x3   :  { %16 = vsyncpa [#allocation4 + $0x1], 0  ;;  %s1024_s21 = smov 0   ;;  %s1026_s22 = smov 0  }
   0x4   :  { %s1028_s23 = smov 0   ;;  %s1030_s24 = smov 0  }
   0x5 LB: > { %s1045_s25 = sadd.s32 4294967295, %s969_s24   ;;  %s767_s26 = sadd.s32 4294967294, %s969_s24   ;;  %s969_s24 = sphi %s1030_s24, %s1316_s24   ;;  %s965_s23 = sphi %s1028_s23, %s1315_s23   ;;  %s961_s22 = sphi %s1026_s22, %s1314_s22   ;;  %s957_s21 = sphi %s1024_s21, %s1313_s21  }
   0x6   : > { %s1049_s27 = sadd.s32 1, %s969_s24   ;;  %s29_s28 = sadd.s32 1, %s965_s23 }
   0x7   : > { %s26_s29 = ssub.s32 %s969_s24, %s1049_s27  ;;  %p36_p0 = scmp.ne.s32.totalorder %s965_s23, %s961_s22 }
   0x8   : > { %p27_p1 = scmp.eq.s32.totalorder %s26_s29, 0  ;;  %p37_p2 = scmp.eq.s32.totalorder %s969_s24, 0 }
   0x9   : > { %p42_p3 = scmp.ne.s32.totalorder %s961_s22, %s957_s21  ;;  %p43_p4 = scmp.eq.s32.totalorder %s1045_s25, 0 }
   0xa   : > { %s1061_s30 = scalar_select %p27_p1, %s965_s23, %s29_s28  }
   0xb   : > { %p38_p5 = por %p37_p2, %p36_p0  ;;  %p1063_p6 = por %p43_p4, %p42_p3 }
   0xc   : > { %p171_p7 = scmp.eq.s32.totalorder %s1045_s25, 1  ;;  %p177_p8 = scmp.eq.s32.totalorder %s767_s26, 1 }
   0xd   : > { %p818_p10 = scmp.lt.s32.totalorder %s969_s24, 2  ;;  %s212_s10 = sand.u32 1, %s965_s23  }
   0xe   : > { %p1070_p11 = por %p171_p7, %p36_p0  ;;  %p1074_p12 = por %p177_p8, %p42_p3 }
   0xf   : > { %s804_s11 = smul.u32 384, %s969_s24  ;;  %p1085_p13 = pnand %p818_p10, %p38_p5 }
  0x10   : > { %s1301_s8 = scalar_select %p1070_p11, 1, 0 }
  0x11   : > { %s1302_s9 = scalar_select %p1074_p12, 1, 0 }
  0x12   : > { %s803_s12 = smul.u32 24, %s212_s10  ;;  %s1083_s15 = scalar_lea.hbm %s1292_s0, %s804_s11 }
  0x13   : > { %s1091_s19 = scalar_lea.sflag [#allocation3], %s212_s10  ;;  %s873_s20 = scalar_lea.hbm %s1083_s15, 384 }
  0x14   : > { %s216_s17 = scalar_lea.vmem [#allocation2], %s803_s12  ;;  %p874_p0 = scmp.ne.s32.totalorder %s1083_s15, %s873_s20 }
  0x15   : > { %s223_s18 = sshll.u32 %s216_s17, 4  ;;  %p875_p1 = pneg %p1085_p13  ;;  %s1089_s18 = int_to_ptr.vmem [resolvable:$true] %s223_s18 }
  0x16   : > { %s878_s29 = scalar_lea.hbm %s1292_s0, 768  ;;  %p879_p4 = scmp.lt.u32.totalorder %s1083_s15, %s1292_s0 }
  0x17   : > { %p876_p2 = pnand %p875_p1, %p874_p0  ;;  %p880_p5 = scmp.lt.u32.totalorder %s878_s29, %s873_s20 }
  0x18   : > { %p882_p8 = scmp.lt.u32.totalorder %s873_s20, %s1083_s15 }
  0x19   : > { %p877_p3 = pneg %p876_p2  ;;  %p881_p7 = por %p880_p5, %p879_p4 }
  0x1b   : > { %p883_p10 = por %p882_p8, %p881_p7 }
  0x1d   : > { %p884_p9 = pnand %p883_p10, %p877_p3 }
  0x1f   : > { %887 = shalt.err (!%p884_p9)
}
  0x20   : > { %s888_s10 = scalar_lea.vmem %s1089_s18, 384  ;;  %s971_s12 = smov [#allocation2]  }
  0x21   : > { %p889_p0 = scmp.ne.s32.totalorder %s1089_s18, %s888_s10  ;;  %s893_s14 = sshll.u32 %s971_s12, 4  ;;  %s894_s14 = int_to_ptr.vmem [resolvable:$false] %s893_s14 }
  0x22   : > { %s895_s17 = scalar_lea.vmem %s894_s14, 768  ;;  %p896_p11 = scmp.lt.s32.totalorder %s1089_s18, %s894_s14 }
  0x23   : > { %p891_p2 = pnand %p889_p0, %p875_p1  ;;  %p897_p4 = scmp.lt.s32.totalorder %s895_s17, %s888_s10 }
  0x25   : > { %p892_p12 = pneg %p891_p2  ;;  %p898_p5 = por %p897_p4, %p896_p11 }
  0x27   : > { %p899_p7 = pnand %p898_p5, %p892_p12 }
  0x29   : > { %902 = shalt.err (!%p899_p7)
}
  0x2a   : > { %s972_s20 = smov 192   ;;  %s973_s26 = smov 12  }
  0x2b   : > { %813 = dma.hbm_to_vmem [thread:$0]  (!%p1085_p13), %s1083_s15, 384, %s1089_s18, %s1091_s19, %s972_s20, %s972_s20, %s973_s26  }
  0x2c   : > { %p771_p9 = scmp.ge.s32.totalorder %s969_s24, 1  ;;  %p231_p1 = scmp.lt.s32.totalorder %s969_s24, 3 }
  0x2e   : > { %p232_p3 = pnand %p771_p9, %p231_p1 }
  0x2f   : > { %s1122_s28 = sand.u32 (!%p232_p3), 1, %s961_s22   ;;  %v277_v0 = vlaneseq (!%p232_p3) }
  0x30   : > { %235 = sbr.rel (%p232_p3) target bundleno = 796 (0x31c), region = 44  ;;  %s238_s11 = scalar_lea.sflag (!%p232_p3), [#allocation3], %s1122_s28 }
  0x31   : > { %s805_s29 = smul.u32 (!%p232_p3), 24, %s1122_s28 }
  0x33   : > { %s1126_s13 = scalar_lea.vmem (!%p232_p3), [#allocation2], %s805_s29 }
  0x37   : > { %948 = dma.done.wait (%p1063_p6), %s238_s11, 384  }
  0x38   : > { %950 = vsyncadd (%p1063_p6), %s238_s11, 4294966912  ;;  %v974_v1 = vmov 0   ;;  %v278_v2 = vand.u32 127, %v277_v0  ;;  %s975_s7 = smov 18   ;;  %s976_s15 = smov 2   ;;  %v1139_v9 = vld [vmem:[%s1126_s13] sm:$0xff] }
  0x39   : > { %868 = vset.pattern.permute.xlu1 %v974_v1  ;;  %869 = vset.pattern.permute.xlu0 %v974_v1  ;;  %v1142_v10 = vld [vmem:[%s1126_s13 + $0xc] sm:$0xff]  ;;  %s977_s16 = smov 32   ;;  %s978_s18 = smov 16   ;;  %v1149_v12 = vld [vmem:[%s1126_s13 + $0x8] sm:$0xf]  ;;  %vm316_vm7 = vcmask 15360  }
  0x3a   : > { %671 = vmatprep.mubr.bf16.mxu1 %v974_v1  ;;  %v279_v3 = vadd.s32 128, %v278_v2  ;;  %v284_v4 = vand.u32 15, %v278_v2  ;;  %v1146_v11 = vcombine.high %v1139_v9, %v1142_v10  ;;  %v1152_v13 = vld [vmem:[%s1126_s13 + $0x14] sm:$0xf]  ;;  %s979_s19 = smov 34   ;;  %s980_s10 = smov 127   ;;  %v1161_v15 = vcombine.low %v1139_v9, %v1142_v10 }
  0x3b   : > { %v1157_v14 = vcombine.low %v1149_v12, %v1152_v13  ;;  %s981_s12 = smov 111   ;;  %vm328_vm8 = vcmask 130048   ;;  %s982_s14 = smov 126   ;;  %vm398_vm13 = vcmask 1039360   ;;  %vm339_vm14 = vcmask 146432  }
  0x3c   : > { %v291_v5 = vand.u32 15, %v279_v3  ;;  %vm306_vm0 = vcmp.le.s32.totalorder %v284_v4, 14  ;;  %vm304_vm1 = vcmp.ge.s32.totalorder %v284_v4, 1  ;;  %s983_s17 = smov 96   ;;  %s984_s20 = smov 112  }
  0x3d   : > { %s985_s26 = smov 110   ;;  %s986_s29 = smov 95   ;;  %v1221_v7 = vld.sshfl [vmem:[%s1293_s1] sm:$0x33 pattern:$0x76325410] }
  0x3e   : > { %vm307_vm2 = vcmp.le.s32.totalorder %v291_v5, 14  ;;  %vm305_vm3 = vcmp.ge.s32.totalorder %v291_v5, 1  ;;  %p1310_p11 = scmp.ne.s32.totalorder %s1301_s8, 0 }
  0x3f   : > { %vm311_vm4 = vmpackc.low %vm307_vm2, %vm306_vm0 }
  0x40   : > { %v312_v6 = vsel %vm311_vm4, 65537, %v974_v1  ;;  %vm1132_vm5 = vmpackc.low %vm305_vm3, %vm304_vm1  ;;  %vm350_vm1 = vcmask 261120   ;;  %vm361_vm3 = vcmask 277504  }
  0x41   : > { %336 = vrot.lane.b32.xlu1 %v312_v6, %s975_s7  ;;  %313 = vrot.lane.b32.xlu0 %v312_v6, %s976_s15  ;;  %v324_v8 = vsel %vm1132_vm5, 65537, %v974_v1  ;;  %v309_v16 = vsel %vm1132_vm5, %v1139_v9, 0  ;;  %v310_v17 = vsel %vm1132_vm5, %v1142_v10, 0  ;;  %s987_s7 = smov 94  }
  0x42   : > { %v774_v18 = vcombine.high %v309_v16, %v310_v17  ;;  %v773_v19 = vcombine.low %v309_v16, %v310_v17 }
  0x44   : > { %560 = vmatprep.subr.bf16.mxu0 %v774_v18 }
  0x45   : > { %347 = vrot.lane.b32.xlu1 %v324_v8, %s977_s16  ;;  %325 = vrot.lane.b32.xlu0 %v324_v8, %s978_s18  ;;  %v554_v8 = vcombine.high %v1221_v7, %v1221_v7  ;;  %s988_s18 = smov [#allocation5]  }
  0x46   : > { %561 = vmatpush1.bf16.msra.mxu0 %v773_v19 }
  0x47   : > { %794 = vmatprep.mubr.msk.bf16.mxu0 %vm328_vm8, %v554_v8 }
  0x49   : > { %358 = vrot.lane.b32.xlu0 %v312_v6, %s979_s19  ;;  %394 = vrot.lane.b32.xlu1 %v1146_v11, %s980_s10  ;;  %s907_s19 = sshll.u32 %s988_s18, 4  ;;  %s908_s19 = int_to_ptr.vmem [resolvable:$false] %s907_s19 }
  0x4d   : > { %396 = vrot.lane.b32.xlu0 %v1157_v14, %s980_s10  ;;  %392 = vrot.lane.b32.xlu1 %v1161_v15, %s980_s10  ;;  %s909_s10 = scalar_lea.vmem %s908_s19, 512 }
  0x51   : > { %453 = vrot.lane.b32.xlu0 %v1146_v11, %s981_s12  ;;  %455 = vrot.lane.b32.xlu1 %v1157_v14, %s981_s12 }
  0x55   : > { %451 = vrot.lane.b32.xlu0 %v1161_v15, %s981_s12 }
  0xb3   : > { %v337_v20 = vpop.permute.xlu1 %336  ;;  %v314_v21 = vpop.permute.xlu0 %313 }
  0xb4   : > { %v315_v22 = vrot.slane %v314_v21, 4  ;;  %v338_v38 = vrot.slane %v337_v20, 4 }
  0xb6   : > { %vm319_vm6 = vcmp.ne.s16.totalorder %v315_v22, 0  ;;  %v317_v29 = vsel %vm316_vm7, %v315_v22, %v314_v21  ;;  %v340_v50 = vsel %vm339_vm14, %v338_v38, %v337_v20  ;;  %vm342_vm0 = vcmp.ne.s16.totalorder %v338_v38, 0 }
  0xb7   : > { %v348_v23 = vpop.permute.xlu1 %347  ;;  %v326_v24 = vpop.permute.xlu0 %325  ;;  %v321_v25 = vsel %vm319_vm6, %v1149_v12, 0  ;;  %v323_v26 = vsel %vm319_vm6, %v1152_v13, 0  ;;  %vm318_vm12 = vcmp.ne.s16.totalorder %v317_v29, 0  ;;  %vm341_vm15 = vcmp.ne.s16.totalorder %v340_v50, 0 }
  0xb8   : > { %v349_v27 = vrot.slane %v348_v23, 4  ;;  %v327_v28 = vrot.slane %v326_v24, 4  ;;  %v780_v30 = vcombine.low %v321_v25, %v323_v26  ;;  %v320_v47 = vsel %vm318_vm12, %v1139_v9, 0 }
  0xb9   : > { %v322_v48 = vsel %vm318_vm12, %v1142_v10, 0  ;;  %v343_v55 = vsel %vm341_vm15, %v1139_v9, 0  ;;  %v345_v56 = vsel %vm341_vm15, %v1142_v10, 0  ;;  %v344_v58 = vsel %vm342_vm0, %v1149_v12, 0 }
  0xba   : > { %vm1176_vm9 = vcmp.ne.s16.totalorder %v349_v27, 0  ;;  %v329_v32 = vsel %vm328_vm8, %v327_v28, %v326_v24  ;;  %vm1181_vm10 = vcmp.ne.s16.totalorder %v327_v28, 0  ;;  %420 = vrot.lane.b32.xlu1 %v780_v30, %s982_s14  ;;  %v779_v53 = vcombine.high %v320_v47, %v322_v48 }
  0xbb   : > { %v359_v34 = vpop.permute.xlu0 %358  ;;  %v395_v35 = vpop.permute.xlu1 %394  ;;  %v355_v36 = vsel %vm1176_vm9, %v1149_v12, 0  ;;  %v357_v37 = vsel %vm1176_vm9, %v1152_v13, 0  ;;  %vm330_vm11 = vcmp.ne.s16.totalorder %v329_v32, 0  ;;  %v333_v39 = vsel %vm1181_vm10, %v1149_v12, 0 }
  0xbc   : > { %v335_v40 = vsel %vm1181_vm10, %v1152_v13, 0  ;;  %v789_v41 = vcombine.low %v355_v36, %v357_v37  ;;  %v332_v42 = vsel %vm330_vm11, %v1139_v9, 0  ;;  %v334_v43 = vsel %vm330_vm11, %v1142_v10, 0 }
  0xbd   : > { %v783_v44 = vcombine.low %v333_v39, %v335_v40  ;;  %v782_v52 = vcombine.high %v332_v42, %v334_v43  ;;  %v781_v54 = vcombine.low %v332_v42, %v334_v43  ;;  %v778_v57 = vcombine.low %v320_v47, %v322_v48 }
  0xbe   : > { %503 = vrot.lane.b32.xlu1 %v789_v41, %s983_s17  ;;  %v346_v59 = vsel %vm342_vm0, %v1152_v13, 0  ;;  %v351_v60 = vsel %vm350_vm1, %v349_v27, %v348_v23  ;;  %v785_v61 = vcombine.high %v343_v55, %v345_v56  ;;  %v360_v63 = vrot.slane %v359_v34, 4 }
  0xbf   : > { %v397_v45 = vpop.permute.xlu0 %396  ;;  %v393_v46 = vpop.permute.xlu1 %392  ;;  %444 = vrot.lane.b32.xlu0 %v783_v44, %s984_s20  ;;  %v786_v62 = vcombine.low %v344_v58, %v346_v59  ;;  %vm352_vm2 = vcmp.ne.s16.totalorder %v351_v60, 0  ;;  %v784_v0 = vcombine.low %v343_v55, %v345_v56  ;;  %vm422_vm6 = vcmask 1031168  }
  0xc0   : > { %v400_v49 = vsel %vm398_vm13, %v395_v35, %v397_v45  ;;  %v399_v51 = vsel %vm398_vm13, %v393_v46, %v395_v35  ;;  %v354_v1 = vsel %vm352_vm2, %v1139_v9, 0  ;;  %v356_v2 = vsel %vm352_vm2, %v1142_v10, 0 }
  0xc1   : > { %562 = vmatprep.subr.bf16.mxu0 %v400_v49  ;;  %v362_v3 = vsel %vm361_vm3, %v360_v63, %v359_v34  ;;  %vm364_vm4 = vcmp.ne.s16.totalorder %v360_v63, 0  ;;  %v788_v4 = vcombine.high %v354_v1, %v356_v2  ;;  %vm446_vm7 = vcmask 916480  }
  0xc2   : > { %563 = vmatpush1.bf16.msra.mxu0 %v399_v51  ;;  %442 = vrot.lane.b32.xlu1 %v782_v52, %s984_s20  ;;  %vm363_vm5 = vcmp.ne.s16.totalorder %v362_v3, 0  ;;  %v366_v5 = vsel %vm364_vm4, %v1149_v12, 0  ;;  %v368_v6 = vsel %vm364_vm4, %v1152_v13, 0  ;;  %v601_v13 = vld [vmem:[%s1294_s2] sm:$0xf]  ;;  %vm457_vm8 = vcmask 908288  }
  0xc3   : > { %418 = vrot.lane.b32.xlu0 %v779_v53, %s982_s14  ;;  %v365_v16 = vsel %vm363_vm5, %v1139_v9, 0  ;;  %v367_v17 = vsel %vm363_vm5, %v1142_v10, 0  ;;  %v622_v9 = vld [vmem:[%s1297_s5] sm:$0xff]  ;;  %v454_v19 = vpop.permute.xlu0 %453  ;;  %vm481_vm9 = vcmask 900096   ;;  %vm505_vm10 = vcmask 785408  }
  0xc4   : > { %v791_v12 = vcombine.high %v365_v16, %v367_v17  ;;  %v790_v18 = vcombine.low %v365_v16, %v367_v17  ;;  %v609_v10 = vld [vmem:[%s1295_s3] sm:$0xf]  ;;  %vm516_vm11 = vcmask 777216   ;;  %vm540_vm12 = vcmask 769024  }
  0xc5   : > { %vm632_vm13 = vcmask 1041408   ;;  %vm628_vm14 = vcmask 31744  }
  0xc6   : > { %440 = vrot.lane.b32.xlu1 %v781_v54, %s984_s20  ;;  %s772_s20 = sshll.u32 %s1122_s28, 4 }
  0xc7   : > { %416 = vrot.lane.b32.xlu0 %v778_v57, %s982_s14  ;;  %v452_v21 = vpop.permute.xlu0 %451 }
  0xc8   : > { %v458_v37 = vsel %vm457_vm8, %v452_v21, %v454_v19 }
  0xca   : > { %477 = vrot.lane.b32.xlu1 %v785_v61, %s985_s26 }
  0xcb   : > { %479 = vrot.lane.b32.xlu0 %v786_v62, %s985_s26 }
  0xce   : > { %475 = vrot.lane.b32.xlu1 %v784_v0, %s985_s26  ;;  %s802_s26 = sshll.u32 %s1045_s25, 8  ;;  %s683_s25 = scalar_lea.sflag [#allocation4], %s1122_s28 }
  0xcf   : > { %514 = vrot.lane.b32.xlu0 %v1157_v14, %s986_s29  ;;  %v787_v14 = vcombine.low %v354_v1, %v356_v2  ;;  %s1248_s15 = scalar_lea.hbm %s1298_s6, %s802_s26 }
  0xd2   : > { %512 = vrot.lane.b32.xlu1 %v1146_v11, %s986_s29  ;;  %v792_v11 = vcombine.low %v366_v5, %v368_v6 }
  0xd3   : > { %501 = vrot.lane.b32.xlu0 %v788_v4, %s983_s17  ;;  %v619_v4 = vld [vmem:[%s1296_s4] sm:$0xf] }
  0xd6   : > { %510 = vrot.lane.b32.xlu1 %v1161_v15, %s986_s29  ;;  %v456_v15 = vpop.permute.xlu1 %455  ;;  %s269_s29 = scalar_lea.vmem [#allocation5], %s772_s20 }
  0xd7   : > { %499 = vrot.lane.b32.xlu0 %v787_v14, %s983_s17  ;;  %v459_v34 = vsel %vm457_vm8, %v454_v19, %v456_v15  ;;  %s697_s11 = sshll.u32 %s269_s29, 4  ;;  %s1250_s11 = int_to_ptr.vmem [resolvable:$true] %s697_s11 }
  0xd8   : > { %s903_s16 = scalar_lea.vmem %s1250_s11, 256  ;;  %p910_p8 = scmp.lt.s32.totalorder %s1250_s11, %s908_s19 }
  0xd9   : > { %p904_p6 = scmp.ne.s32.totalorder %s1250_s11, %s903_s16  ;;  %p911_p10 = scmp.lt.s32.totalorder %s909_s10, %s903_s16 }
  0xda   : > { %538 = vrot.lane.b32.xlu1 %v792_v11, %s987_s7 }
  0xdb   : > { %536 = vrot.lane.b32.xlu0 %v791_v12, %s987_s7  ;;  %p905_p12 = pnand %p904_p6, %p1310_p11  ;;  %p912_p0 = por %p911_p10, %p910_p8 }
  0xdd   : > { %p906_p13 = pneg %p905_p12 }
  0xde   : > { %604 = vperm.xlu1 %868, %v601_v13  }
  0xdf   : > { %534 = vrot.lane.b32.xlu0 %v790_v18, %s987_s7  ;;  %p913_p2 = pnand %p912_p0, %p906_p13 }
  0xe2   : > { %625 = vperm.xlu1 %868, %v622_v9  }
  0xe3   : > { %612 = vperm.xlu0 %869, %v609_v10  }
 0x12c   : > { %v421_v20 = vpop.permute.xlu1 %420 }
 0x130   : > { %v504_v22 = vpop.permute.xlu1 %503 }
 0x131   : > { %v445_v23 = vpop.permute.xlu0 %444 }
 0x134   : > { %v443_v24 = vpop.permute.xlu1 %442 }
 0x135   : > { %v419_v25 = vpop.permute.xlu0 %418  ;;  %v448_v30 = vsel %vm446_vm7, %v443_v24, %v445_v23 }
 0x136   : > { %v424_v26 = vsel %vm422_vm6, %v419_v25, %v421_v20 }
 0x137   : > { %564 = vmatprep.subr.bf16.mxu0 %v424_v26 }
 0x138   : > { %v441_v27 = vpop.permute.xlu1 %440 }
 0x139   : > { %v417_v28 = vpop.permute.xlu0 %416  ;;  %v447_v33 = vsel %vm446_vm7, %v441_v27, %v443_v24 }
 0x13a   : > { %v423_v29 = vsel %vm422_vm6, %v417_v28, %v419_v25 }
 0x13b   : > { %565 = vmatpush1.bf16.msra.mxu0 %v423_v29 }
 0x13c   : > { %566 = vmatprep.subr.bf16.mxu0 %v448_v30  ;;  %v478_v31 = vpop.permute.xlu1 %477 }
 0x13d   : > { %v480_v32 = vpop.permute.xlu0 %479 }
 0x13e   : > { %v483_v38 = vsel %vm481_vm9, %v478_v31, %v480_v32 }
 0x13f   : > { %567 = vmatpush1.bf16.msra.mxu0 %v447_v33 }
 0x140   : > { %568 = vmatprep.subr.bf16.mxu0 %v459_v34  ;;  %v476_v35 = vpop.permute.xlu1 %475 }
 0x141   : > { %v515_v36 = vpop.permute.xlu0 %514  ;;  %v482_v41 = vsel %vm481_vm9, %v476_v35, %v478_v31 }
 0x143   : > { %569 = vmatpush1.bf16.msra.mxu0 %v458_v37 }
 0x144   : > { %570 = vmatprep.subr.bf16.mxu0 %v483_v38  ;;  %v513_v39 = vpop.permute.xlu1 %512 }
 0x145   : > { %v502_v40 = vpop.permute.xlu0 %501  ;;  %v518_v46 = vsel %vm516_vm11, %v513_v39, %v515_v36 }
 0x146   : > { %v507_v42 = vsel %vm505_vm10, %v502_v40, %v504_v22 }
 0x147   : > { %571 = vmatpush1.bf16.msra.mxu0 %v482_v41 }
 0x148   : > { %572 = vmatprep.subr.bf16.mxu0 %v507_v42  ;;  %v511_v43 = vpop.permute.xlu1 %510 }
 0x149   : > { %v500_v44 = vpop.permute.xlu0 %499  ;;  %v517_v49 = vsel %vm516_vm11, %v511_v43, %v513_v39 }
 0x14a   : > { %v506_v45 = vsel %vm505_vm10, %v500_v44, %v502_v40 }
 0x14b   : > { %573 = vmatpush1.bf16.msra.mxu0 %v506_v45 }
 0x14c   : > { %574 = vmatprep.subr.bf16.mxu0 %v518_v46  ;;  %v539_v47 = vpop.permute.xlu1 %538 }
 0x14d   : > { %v537_v48 = vpop.permute.xlu0 %536 }
 0x14e   : > { %v542_v50 = vsel %vm540_vm12, %v537_v48, %v539_v47 }
 0x14f   : > { %575 = vmatpush1.bf16.msra.mxu0 %v517_v49 }
 0x150   : > { %576 = vmatprep.subr.bf16.mxu0 %v542_v50 }
 0x151   : > { %v535_v51 = vpop.permute.xlu0 %534 }
 0x152   : > { %v541_v52 = vsel %vm540_vm12, %v535_v51, %v537_v48 }
 0x153   : > { %577 = vmatpush1.bf16.msra.mxu0 %v541_v52 }
 0x156   : > { %593 = vmatmul.mubr.bf16.vlgmr.msra.gmra.mrb[0].mxu0 %v1221_v7 }
 0x15d   : > { %v605_v53 = vpop.permute.xlu1 %604 }
 0x161   : > { %v626_v5 = vpop.permute.xlu1 %625 }
 0x162   : > { %v613_v55 = vpop.permute.xlu0 %612 }
 0x229   : > { %v594_v54 = vpop.f32.mrb[0].mxu0 }
 0x22a   : > { %v607_v56 = vmul.f32 %v605_v53, %v594_v54  ;;  %v596_v57 = vpop.f32.mrb[1].mxu0 }
 0x22b   : > { %v608_v58 = vmul.f32 %v605_v53, %v596_v57  ;;  %v598_v59 = vpop.f32.mrb[2].mxu0 }
 0x22c   : > { %v615_v60 = vadd.f32 %v613_v55, %v607_v56  ;;  %v599_v61 = vpop.f32.mrb[3].mxu0 }
 0x22d   : > { %v616_v62 = vadd.f32 %v613_v55, %v608_v58 }
 0x22e   : > { %v617_v63 = vmax.f32 %v615_v60, 0.0 }
 0x22f   : > { %v618_v0 = vmax.f32 %v616_v62, 0.0 }
 0x230   : > { %v620_v1 = vpack.c.bf16 %v617_v63, %v617_v63 }
 0x231   : > { %v621_v2 = vpack.c.bf16 %v618_v0, %v618_v0 }
 0x232   : > { %v634_v3 = vsel %vm632_vm13, %v620_v1, 0 }
 0x233   : > { %795 = vmatprep.subr.msk.bf16.mxu1 %vm632_vm13, %v621_v2 }
 0x234   : > { %640 = vmatpush1.bf16.msra.mxu1 %v634_v3 }
 0x237   : > { %796 = vmatmul.mubr.msk.bf16.vlgmr.msra.gmra.mrb[0].mxu1 %vm628_vm14, %v619_v4 }
 0x30a   : > { %v673_v6 = vpop.f32.mrb[0].mxu1 }
 0x30b   : > { %v674_v7 = vadd.f32 %v673_v6, %v626_v5  ;;  %v675_v8 = vpop.f32.mrb[1].mxu1 }
 0x30c   : > { %v676_v14 = vadd.f32 %v675_v8, %v626_v5  ;;  %v677_v16 = vpop.f32.mrb[2].mxu1 }
 0x30d   : > { %680 = vst [vmem:[%s269_s29] sm:$0xff] %v674_v7  ;;  %v678_v17 = vpop.f32.mrb[3].mxu1 }
 0x30e   : > { %681 = vst [vmem:[%s269_s29 + $0x8] sm:$0xff] %v676_v14 }
 0x30f   : > { %916 = shalt.err (!%p913_p2)
}
 0x310   : > { %s917_s28 = scalar_lea.hbm %s1248_s15, 256  ;;  %s921_s17 = scalar_lea.hbm %s1298_s6, 512 }
 0x311   : > { %p918_p4 = scmp.ne.s32.totalorder %s1248_s15, %s917_s28  ;;  %p922_p9 = scmp.lt.u32.totalorder %s1248_s15, %s1298_s6 }
 0x312   : > { %p923_p1 = scmp.lt.u32.totalorder %s921_s17, %s917_s28  ;;  %p925_p6 = scmp.lt.u32.totalorder %s917_s28, %s1248_s15 }
 0x313   : > { %p919_p5 = pnand %p918_p4, %p1310_p11 }
 0x314   : > { %p924_p3 = por %p923_p1, %p922_p9 }
 0x315   : > { %p920_p7 = pneg %p919_p5 }
 0x316   : > { %p926_p12 = por %p925_p6, %p924_p3 }
 0x318   : > { %p927_p13 = pnand %p926_p12, %p920_p7 }
 0x31a   : > { %930 = shalt.err (!%p927_p13)
}
 0x31b   : > { %808 = dma.vmem_to_hbm [thread:$0]  (%p1310_p11), %s1250_s11, 256, %s1248_s15, %s683_s25  }
 0x31c PF: > { %s709_s29 = sand.u32 1, %s957_s21   ;;  %p1311_p8 = scmp.ne.s32.totalorder %s1302_s9, 0 }
 0x31d   : > { %p1312_p10 = scmp.ge.s32.totalorder %s969_s24, 2  ;;  %s710_s13 = scalar_lea.sflag [#allocation4], %s709_s29 }
 0x31f   : > { %p815_p0 = pnand %p1312_p10, %p1311_p8 }
 0x321   : > { %952 = dma.done.wait (!%p815_p0), %s710_s13, 256  }
 0x322   : > { %954 = vsyncadd (!%p815_p0), %s710_s13, 4294967040  ;;  %p19_p2 = scmp.ge.s32.totalorder %s1049_s27, 4   ;;  %s1313_s21 = smov %s961_s22 }
 0x323   : > { %s1314_s22 = smov %s965_s23  ;;  %s1315_s23 = smov %s1061_s30 }
 0x324   : > { %s1316_s24 = smov %s1049_s27  ;;  %21 = sbr.rel (!%p19_p2) target bundleno = 5 (0x5), region = 89 }
 0x32b   :  { %715 = vsyncpa [#allocation3], 1 }
 0x32c   :  { %717 = vsyncpa [#allocation3 + $0x1], 1 }
 0x32d   :  { %718 = vsyncpa [#allocation4], 1 }
 0x32e   :  { %720 = vsyncpa [#allocation4 + $0x1], 1 }

</bundles_post_ra>
